<compile_context>
chip_gen: v5e
topology: v5e:2x2
jax: 0.10.0
libtpu: 0.0.40
codegen_flags: <defaults>
</compile_context>

<pallas_src>
import functools

import jax
import jax.numpy as jnp
from jax.experimental import pallas as pl
from jax.experimental.pallas import tpu as pltpu


def _fused_output_block_kernel(x_ref, scal_ref, w1r_ref, head_ref, o_ref, *, c_in, c_out):
    """Fully fused forward pass.

    x_ref   : (Cin, N, HW)     input activations, one (N, HW) slab per input channel
    scal_ref: (Cout, Cin + 2)  SMEM scalar table: [:, :Cin] folded conv*BN weight,
                               [:, Cin] folded bias, [0, Cin+1] fc2 bias
    w1r_ref : (Cout, HW, F1)   fc1 weight, permuted so fc1 = sum_c h_c @ w1r[c]
    head_ref: (2, F1)          row 0 = fc1 bias, row 1 = fc2 weight
    o_ref   : (N, 1)           sigmoid output
    """
    # Load each input channel's (N, HW) slab exactly once.
    x_ch = [x_ref[ci] for ci in range(c_in)]

    z1 = None
    for c in range(c_out):
        # 1x1 conv + folded BN as VPU scalar-broadcast FMAs (latency-bound; skip MXU).
        h = scal_ref[c, 0] * x_ch[0]
        for ci in range(1, c_in):
            h = h + scal_ref[c, ci] * x_ch[ci]
        h = jnp.maximum(h + scal_ref[c, c_in], 0.0)            # + b_fold[c], ReLU

        # fc1 contribution of output-channel c: (N, HW) @ (HW, F1) on the MXU.
        contrib = jnp.dot(h, w1r_ref[c], preferred_element_type=jnp.float32)
        z1 = contrib if z1 is None else z1 + contrib

    head = head_ref[...]                                       # (2, F1)
    z1 = jnp.maximum(z1 + head[0:1, :], 0.0)                   # + fc1 bias, ReLU  (N, F1)

    # fc2 as an XLU lane reduction (no second MXU pass), then bias + sigmoid.
    z2 = jnp.sum(z1 * head[1:2, :], axis=-1, keepdims=True) + scal_ref[0, c_in + 1]
    o_ref[...] = 1.0 / (1.0 + jnp.exp(-z2))


def prepare_params(params, eps=1e-5):
    """One-time parameter prep: BN fold, fc1 weight permutation, bias packing."""
    f32 = jnp.float32
    conv_w = params["conv_w"].astype(f32)[:, :, 0, 0]          # (Cout, Cin)
    c_out, c_in = conv_w.shape

    # Fold eval-mode BatchNorm into the 1x1 conv.
    s = params["bn_gamma"].astype(f32) / jnp.sqrt(params["bn_var"].astype(f32) + eps)
    w_fold = conv_w * s[:, None]                                # (Cout, Cin)
    b_fold = (params["conv_b"].astype(f32) * s
              + params["bn_beta"].astype(f32)
              - params["bn_mean"].astype(f32) * s)              # (Cout,)

    # fc1 weight permuted to (Cout, HW, F1): w1r[c, p, f] = fc1_w[f, c*HW + p].
    f1, cf = params["fc1_w"].shape
    hw = cf // c_out
    w1r = params["fc1_w"].astype(f32).reshape(f1, c_out, hw).transpose(1, 2, 0)

    # fc1 bias + fc2 weight packed into one VMEM operand.
    head = jnp.stack(
        [params["fc1_b"].astype(f32), params["fc2_w"].astype(f32).reshape(f1)], axis=0)

    # Small SMEM scalar table: folded conv weight/bias + fc2 bias.
    scalars = jnp.zeros((c_out, c_in + 2), f32)
    scalars = scalars.at[:, :c_in].set(w_fold)
    scalars = scalars.at[:, c_in].set(b_fold)
    scalars = scalars.at[0, c_in + 1].set(params["fc2_b"].astype(f32)[0])

    return {"scalars": scalars, "w1r": w1r, "head": head}


def output_block_forward(x_nchw, prepped):
    """Pallas implementation of OutputBlock.forward (eval-mode BN), single fused call."""
    f32 = jnp.float32
    n, c_in, h, w = x_nchw.shape
    scalars, w1r, head = prepped["scalars"], prepped["w1r"], prepped["head"]
    c_out = scalars.shape[0]
    hw = h * w

    # Only per-call activation prep: (N,Cin,H,W) -> (Cin,N,HW), ~2 KiB, fuses under jit.
    x3 = jnp.transpose(x_nchw.astype(f32).reshape(n, c_in, hw), (1, 0, 2))

    kernel = functools.partial(_fused_output_block_kernel, c_in=c_in, c_out=c_out)

    return pl.pallas_call(
        kernel,
        out_shape=jax.ShapeDtypeStruct((n, 1), f32),
        in_specs=[
            pl.BlockSpec(memory_space=pltpu.MemorySpace.VMEM),   # x3
            pl.BlockSpec(memory_space=pltpu.MemorySpace.SMEM),   # scalar table
            pl.BlockSpec(memory_space=pltpu.MemorySpace.VMEM),   # w1r
            pl.BlockSpec(memory_space=pltpu.MemorySpace.VMEM),   # head (b1, w2)
        ],
        out_specs=pl.BlockSpec(memory_space=pltpu.MemorySpace.VMEM),
    )(x3, scalars, w1r, head)


def _reference(x_nchw, params, eps=1e-5):
    """Pure-JAX reference (same eval-mode BN semantics)."""
    x = x_nchw.astype(jnp.float32)
    n, c_in, h, w = x.shape
    wc = params["conv_w"][:, :, 0, 0].astype(jnp.float32)       # (Cout, Cin)
    c_out = wc.shape[0]

    y = jnp.einsum("nchw,oc->nohw", x, wc) + params["conv_b"][None, :, None, None]
    mean = params["bn_mean"][None, :, None, None]
    var = params["bn_var"][None, :, None, None]
    gamma = params["bn_gamma"][None, :, None, None]
    beta = params["bn_beta"][None, :, None, None]
    y = (y - mean) / jnp.sqrt(var + eps) * gamma + beta
    y = jnp.maximum(y, 0.0)

    yf = y.reshape(n, c_out * h * w)                             # CHW flatten == torch .view
    z1 = jnp.maximum(yf @ params["fc1_w"].T + params["fc1_b"][None, :], 0.0)
    z2 = z1 @ params["fc2_w"].T + params["fc2_b"][None, :]
    return 1.0 / (1.0 + jnp.exp(-z2))


if __name__ == "__main__":
    # Spatial must be 8x8: fc1 expects output_channels * 8 * 8 features.
    N, Cin, Cout, H, W = 2, 4, 8, 8, 8
    F1 = Cout * 4

    key = jax.random.PRNGKey(0)
    ks = jax.random.split(key, 11)

    x = jax.random.normal(ks[0], (N, Cin, H, W), jnp.float32)
    params = {
        "conv_w": 0.2 * jax.random.normal(ks[1], (Cout, Cin, 1, 1), jnp.float32),
        "conv_b": 0.1 * jax.random.normal(ks[2], (Cout,), jnp.float32),
        "bn_gamma": 1.0 + 0.1 * jax.random.normal(ks[3], (Cout,), jnp.float32),
        "bn_beta": 0.1 * jax.random.normal(ks[4], (Cout,), jnp.float32),
        "bn_mean": 0.1 * jax.random.normal(ks[5], (Cout,), jnp.float32),
        "bn_var": jax.random.uniform(ks[6], (Cout,), jnp.float32, 0.5, 1.5),
        "fc1_w": 0.05 * jax.random.normal(ks[7], (F1, Cout * H * W), jnp.float32),
        "fc1_b": 0.1 * jax.random.normal(ks[8], (F1,), jnp.float32),
        "fc2_w": 0.1 * jax.random.normal(ks[9], (1, F1), jnp.float32),
        "fc2_b": 0.1 * jax.random.normal(ks[10], (1,), jnp.float32),
    }

    # Parameter folding is done ONCE, outside the per-call path.
    prepped = jax.tree_util.tree_map(jax.block_until_ready, prepare_params(params))

    fwd = jax.jit(output_block_forward)
    out = jax.block_until_ready(fwd(x, prepped))
    ref = jax.block_until_ready(_reference(x, params))

    assert out.shape == (N, 1), out.shape
    assert jnp.allclose(out, ref, atol=1e-4, rtol=1e-4), float(jnp.max(jnp.abs(out - ref)))

    print("KERNEL_OK")
</pallas_src>

<mosaic_0001>
module attributes {stable_mosaic.version = 11 : i64} {
  func.func @_fused_output_block_kernel(%arg0: memref<4x2x64xf32, #tpu.memory_space<vmem>>, %arg1: memref<8x6xf32, #tpu.memory_space<smem>>, %arg2: memref<8x64x32xf32, #tpu.memory_space<vmem>>, %arg3: memref<2x32xf32, #tpu.memory_space<vmem>>, %arg4: memref<2x1xf32, #tpu.memory_space<vmem>>) attributes {dimension_semantics = [], scalar_prefetch = 0 : i64, scratch_operands = 0 : i64, tpu.core_type = #tpu.core_type<tc>} {
    %c0 = arith.constant 0 : index
    %c0_0 = arith.constant 0 : index
    %c0_1 = arith.constant 0 : index
    %0 = vector.load %arg0[%c0, %c0_0, %c0_1] : memref<4x2x64xf32, #tpu.memory_space<vmem>>, vector<1x2x64xf32>
    %1 = vector.shape_cast %0 : vector<1x2x64xf32> to vector<2x64xf32>
    %c1 = arith.constant 1 : index
    %c0_2 = arith.constant 0 : index
    %c0_3 = arith.constant 0 : index
    %2 = vector.load %arg0[%c1, %c0_2, %c0_3] : memref<4x2x64xf32, #tpu.memory_space<vmem>>, vector<1x2x64xf32>
    %3 = vector.shape_cast %2 : vector<1x2x64xf32> to vector<2x64xf32>
    %c2 = arith.constant 2 : index
    %c0_4 = arith.constant 0 : index
    %c0_5 = arith.constant 0 : index
    %4 = vector.load %arg0[%c2, %c0_4, %c0_5] : memref<4x2x64xf32, #tpu.memory_space<vmem>>, vector<1x2x64xf32>
    %5 = vector.shape_cast %4 : vector<1x2x64xf32> to vector<2x64xf32>
    %c3 = arith.constant 3 : index
    %c0_6 = arith.constant 0 : index
    %c0_7 = arith.constant 0 : index
    %6 = vector.load %arg0[%c3, %c0_6, %c0_7] : memref<4x2x64xf32, #tpu.memory_space<vmem>>, vector<1x2x64xf32>
    %7 = vector.shape_cast %6 : vector<1x2x64xf32> to vector<2x64xf32>
    %c0_8 = arith.constant 0 : index
    %c0_9 = arith.constant 0 : index
    %8 = memref.load %arg1[%c0_8, %c0_9] : memref<8x6xf32, #tpu.memory_space<smem>>
    %9 = vector.broadcast %8 : f32 to vector<2x64xf32>
    %10 = arith.mulf %9, %1 : vector<2x64xf32>
    %c0_10 = arith.constant 0 : index
    %c1_11 = arith.constant 1 : index
    %11 = memref.load %arg1[%c0_10, %c1_11] : memref<8x6xf32, #tpu.memory_space<smem>>
    %12 = vector.broadcast %11 : f32 to vector<2x64xf32>
    %13 = arith.mulf %12, %3 : vector<2x64xf32>
    %14 = arith.addf %10, %13 : vector<2x64xf32>
    %c0_12 = arith.constant 0 : index
    %c2_13 = arith.constant 2 : index
    %15 = memref.load %arg1[%c0_12, %c2_13] : memref<8x6xf32, #tpu.memory_space<smem>>
    %16 = vector.broadcast %15 : f32 to vector<2x64xf32>
    %17 = arith.mulf %16, %5 : vector<2x64xf32>
    %18 = arith.addf %14, %17 : vector<2x64xf32>
    %c0_14 = arith.constant 0 : index
    %c3_15 = arith.constant 3 : index
    %19 = memref.load %arg1[%c0_14, %c3_15] : memref<8x6xf32, #tpu.memory_space<smem>>
    %20 = vector.broadcast %19 : f32 to vector<2x64xf32>
    %21 = arith.mulf %20, %7 : vector<2x64xf32>
    %22 = arith.addf %18, %21 : vector<2x64xf32>
    %c0_16 = arith.constant 0 : index
    %c4 = arith.constant 4 : index
    %23 = memref.load %arg1[%c0_16, %c4] : memref<8x6xf32, #tpu.memory_space<smem>>
    %24 = vector.broadcast %23 : f32 to vector<2x64xf32>
    %25 = arith.addf %22, %24 : vector<2x64xf32>
    %cst = arith.constant 0.000000e+00 : f32
    %26 = vector.broadcast %cst : f32 to vector<2x64xf32>
    %27 = arith.maximumf %25, %26 : vector<2x64xf32>
    %c0_17 = arith.constant 0 : index
    %c0_18 = arith.constant 0 : index
    %c0_19 = arith.constant 0 : index
    %28 = vector.load %arg2[%c0_17, %c0_18, %c0_19] : memref<8x64x32xf32, #tpu.memory_space<vmem>>, vector<1x64x32xf32>
    %29 = vector.shape_cast %28 : vector<1x64x32xf32> to vector<64x32xf32>
    %cst_20 = arith.constant dense<0.000000e+00> : vector<2x32xf32>
    %30 = tpu.matmul %27, %29, %cst_20 {dimension_numbers = #tpu.dot_dimension_numbers<[1], [0], [0], [1], [0, 0, 1, 1], [], []>} : vector<2x64xf32>, vector<64x32xf32>, vector<2x32xf32> -> vector<2x32xf32>
    %c1_21 = arith.constant 1 : index
    %c0_22 = arith.constant 0 : index
    %31 = memref.load %arg1[%c1_21, %c0_22] : memref<8x6xf32, #tpu.memory_space<smem>>
    %32 = vector.broadcast %31 : f32 to vector<2x64xf32>
    %33 = arith.mulf %32, %1 : vector<2x64xf32>
    %c1_23 = arith.constant 1 : index
    %c1_24 = arith.constant 1 : index
    %34 = memref.load %arg1[%c1_23, %c1_24] : memref<8x6xf32, #tpu.memory_space<smem>>
    %35 = vector.broadcast %34 : f32 to vector<2x64xf32>
    %36 = arith.mulf %35, %3 : vector<2x64xf32>
    %37 = arith.addf %33, %36 : vector<2x64xf32>
    %c1_25 = arith.constant 1 : index
    %c2_26 = arith.constant 2 : index
    %38 = memref.load %arg1[%c1_25, %c2_26] : memref<8x6xf32, #tpu.memory_space<smem>>
    %39 = vector.broadcast %38 : f32 to vector<2x64xf32>
    %40 = arith.mulf %39, %5 : vector<2x64xf32>
    %41 = arith.addf %37, %40 : vector<2x64xf32>
    %c1_27 = arith.constant 1 : index
    %c3_28 = arith.constant 3 : index
    %42 = memref.load %arg1[%c1_27, %c3_28] : memref<8x6xf32, #tpu.memory_space<smem>>
    %43 = vector.broadcast %42 : f32 to vector<2x64xf32>
    %44 = arith.mulf %43, %7 : vector<2x64xf32>
    %45 = arith.addf %41, %44 : vector<2x64xf32>
    %c1_29 = arith.constant 1 : index
    %c4_30 = arith.constant 4 : index
    %46 = memref.load %arg1[%c1_29, %c4_30] : memref<8x6xf32, #tpu.memory_space<smem>>
    %47 = vector.broadcast %46 : f32 to vector<2x64xf32>
    %48 = arith.addf %45, %47 : vector<2x64xf32>
    %cst_31 = arith.constant 0.000000e+00 : f32
    %49 = vector.broadcast %cst_31 : f32 to vector<2x64xf32>
    %50 = arith.maximumf %48, %49 : vector<2x64xf32>
    %c1_32 = arith.constant 1 : index
    %c0_33 = arith.constant 0 : index
    %c0_34 = arith.constant 0 : index
    %51 = vector.load %arg2[%c1_32, %c0_33, %c0_34] : memref<8x64x32xf32, #tpu.memory_space<vmem>>, vector<1x64x32xf32>
    %52 = vector.shape_cast %51 : vector<1x64x32xf32> to vector<64x32xf32>
    %cst_35 = arith.constant dense<0.000000e+00> : vector<2x32xf32>
    %53 = tpu.matmul %50, %52, %cst_35 {dimension_numbers = #tpu.dot_dimension_numbers<[1], [0], [0], [1], [0, 0, 1, 1], [], []>} : vector<2x64xf32>, vector<64x32xf32>, vector<2x32xf32> -> vector<2x32xf32>
    %54 = arith.addf %30, %53 : vector<2x32xf32>
    %c2_36 = arith.constant 2 : index
    %c0_37 = arith.constant 0 : index
    %55 = memref.load %arg1[%c2_36, %c0_37] : memref<8x6xf32, #tpu.memory_space<smem>>
    %56 = vector.broadcast %55 : f32 to vector<2x64xf32>
    %57 = arith.mulf %56, %1 : vector<2x64xf32>
    %c2_38 = arith.constant 2 : index
    %c1_39 = arith.constant 1 : index
    %58 = memref.load %arg1[%c2_38, %c1_39] : memref<8x6xf32, #tpu.memory_space<smem>>
    %59 = vector.broadcast %58 : f32 to vector<2x64xf32>
    %60 = arith.mulf %59, %3 : vector<2x64xf32>
    %61 = arith.addf %57, %60 : vector<2x64xf32>
    %c2_40 = arith.constant 2 : index
    %c2_41 = arith.constant 2 : index
    %62 = memref.load %arg1[%c2_40, %c2_41] : memref<8x6xf32, #tpu.memory_space<smem>>
    %63 = vector.broadcast %62 : f32 to vector<2x64xf32>
    %64 = arith.mulf %63, %5 : vector<2x64xf32>
    %65 = arith.addf %61, %64 : vector<2x64xf32>
    %c2_42 = arith.constant 2 : index
    %c3_43 = arith.constant 3 : index
    %66 = memref.load %arg1[%c2_42, %c3_43] : memref<8x6xf32, #tpu.memory_space<smem>>
    %67 = vector.broadcast %66 : f32 to vector<2x64xf32>
    %68 = arith.mulf %67, %7 : vector<2x64xf32>
    %69 = arith.addf %65, %68 : vector<2x64xf32>
    %c2_44 = arith.constant 2 : index
    %c4_45 = arith.constant 4 : index
    %70 = memref.load %arg1[%c2_44, %c4_45] : memref<8x6xf32, #tpu.memory_space<smem>>
    %71 = vector.broadcast %70 : f32 to vector<2x64xf32>
    %72 = arith.addf %69, %71 : vector<2x64xf32>
    %cst_46 = arith.constant 0.000000e+00 : f32
    %73 = vector.broadcast %cst_46 : f32 to vector<2x64xf32>
    %74 = arith.maximumf %72, %73 : vector<2x64xf32>
    %c2_47 = arith.constant 2 : index
    %c0_48 = arith.constant 0 : index
    %c0_49 = arith.constant 0 : index
    %75 = vector.load %arg2[%c2_47, %c0_48, %c0_49] : memref<8x64x32xf32, #tpu.memory_space<vmem>>, vector<1x64x32xf32>
    %76 = vector.shape_cast %75 : vector<1x64x32xf32> to vector<64x32xf32>
    %cst_50 = arith.constant dense<0.000000e+00> : vector<2x32xf32>
    %77 = tpu.matmul %74, %76, %cst_50 {dimension_numbers = #tpu.dot_dimension_numbers<[1], [0], [0], [1], [0, 0, 1, 1], [], []>} : vector<2x64xf32>, vector<64x32xf32>, vector<2x32xf32> -> vector<2x32xf32>
    %78 = arith.addf %54, %77 : vector<2x32xf32>
    %c3_51 = arith.constant 3 : index
    %c0_52 = arith.constant 0 : index
    %79 = memref.load %arg1[%c3_51, %c0_52] : memref<8x6xf32, #tpu.memory_space<smem>>
    %80 = vector.broadcast %79 : f32 to vector<2x64xf32>
    %81 = arith.mulf %80, %1 : vector<2x64xf32>
    %c3_53 = arith.constant 3 : index
    %c1_54 = arith.constant 1 : index
    %82 = memref.load %arg1[%c3_53, %c1_54] : memref<8x6xf32, #tpu.memory_space<smem>>
    %83 = vector.broadcast %82 : f32 to vector<2x64xf32>
    %84 = arith.mulf %83, %3 : vector<2x64xf32>
    %85 = arith.addf %81, %84 : vector<2x64xf32>
    %c3_55 = arith.constant 3 : index
    %c2_56 = arith.constant 2 : index
    %86 = memref.load %arg1[%c3_55, %c2_56] : memref<8x6xf32, #tpu.memory_space<smem>>
    %87 = vector.broadcast %86 : f32 to vector<2x64xf32>
    %88 = arith.mulf %87, %5 : vector<2x64xf32>
    %89 = arith.addf %85, %88 : vector<2x64xf32>
    %c3_57 = arith.constant 3 : index
    %c3_58 = arith.constant 3 : index
    %90 = memref.load %arg1[%c3_57, %c3_58] : memref<8x6xf32, #tpu.memory_space<smem>>
    %91 = vector.broadcast %90 : f32 to vector<2x64xf32>
    %92 = arith.mulf %91, %7 : vector<2x64xf32>
    %93 = arith.addf %89, %92 : vector<2x64xf32>
    %c3_59 = arith.constant 3 : index
    %c4_60 = arith.constant 4 : index
    %94 = memref.load %arg1[%c3_59, %c4_60] : memref<8x6xf32, #tpu.memory_space<smem>>
    %95 = vector.broadcast %94 : f32 to vector<2x64xf32>
    %96 = arith.addf %93, %95 : vector<2x64xf32>
    %cst_61 = arith.constant 0.000000e+00 : f32
    %97 = vector.broadcast %cst_61 : f32 to vector<2x64xf32>
    %98 = arith.maximumf %96, %97 : vector<2x64xf32>
    %c3_62 = arith.constant 3 : index
    %c0_63 = arith.constant 0 : index
    %c0_64 = arith.constant 0 : index
    %99 = vector.load %arg2[%c3_62, %c0_63, %c0_64] : memref<8x64x32xf32, #tpu.memory_space<vmem>>, vector<1x64x32xf32>
    %100 = vector.shape_cast %99 : vector<1x64x32xf32> to vector<64x32xf32>
    %cst_65 = arith.constant dense<0.000000e+00> : vector<2x32xf32>
    %101 = tpu.matmul %98, %100, %cst_65 {dimension_numbers = #tpu.dot_dimension_numbers<[1], [0], [0], [1], [0, 0, 1, 1], [], []>} : vector<2x64xf32>, vector<64x32xf32>, vector<2x32xf32> -> vector<2x32xf32>
    %102 = arith.addf %78, %101 : vector<2x32xf32>
    %c4_66 = arith.constant 4 : index
    %c0_67 = arith.constant 0 : index
    %103 = memref.load %arg1[%c4_66, %c0_67] : memref<8x6xf32, #tpu.memory_space<smem>>
    %104 = vector.broadcast %103 : f32 to vector<2x64xf32>
    %105 = arith.mulf %104, %1 : vector<2x64xf32>
    %c4_68 = arith.constant 4 : index
    %c1_69 = arith.constant 1 : index
    %106 = memref.load %arg1[%c4_68, %c1_69] : memref<8x6xf32, #tpu.memory_space<smem>>
    %107 = vector.broadcast %106 : f32 to vector<2x64xf32>
    %108 = arith.mulf %107, %3 : vector<2x64xf32>
    %109 = arith.addf %105, %108 : vector<2x64xf32>
    %c4_70 = arith.constant 4 : index
    %c2_71 = arith.constant 2 : index
    %110 = memref.load %arg1[%c4_70, %c2_71] : memref<8x6xf32, #tpu.memory_space<smem>>
    %111 = vector.broadcast %110 : f32 to vector<2x64xf32>
    %112 = arith.mulf %111, %5 : vector<2x64xf32>
    %113 = arith.addf %109, %112 : vector<2x64xf32>
    %c4_72 = arith.constant 4 : index
    %c3_73 = arith.constant 3 : index
    %114 = memref.load %arg1[%c4_72, %c3_73] : memref<8x6xf32, #tpu.memory_space<smem>>
    %115 = vector.broadcast %114 : f32 to vector<2x64xf32>
    %116 = arith.mulf %115, %7 : vector<2x64xf32>
    %117 = arith.addf %113, %116 : vector<2x64xf32>
    %c4_74 = arith.constant 4 : index
    %c4_75 = arith.constant 4 : index
    %118 = memref.load %arg1[%c4_74, %c4_75] : memref<8x6xf32, #tpu.memory_space<smem>>
    %119 = vector.broadcast %118 : f32 to vector<2x64xf32>
    %120 = arith.addf %117, %119 : vector<2x64xf32>
    %cst_76 = arith.constant 0.000000e+00 : f32
    %121 = vector.broadcast %cst_76 : f32 to vector<2x64xf32>
    %122 = arith.maximumf %120, %121 : vector<2x64xf32>
    %c4_77 = arith.constant 4 : index
    %c0_78 = arith.constant 0 : index
    %c0_79 = arith.constant 0 : index
    %123 = vector.load %arg2[%c4_77, %c0_78, %c0_79] : memref<8x64x32xf32, #tpu.memory_space<vmem>>, vector<1x64x32xf32>
    %124 = vector.shape_cast %123 : vector<1x64x32xf32> to vector<64x32xf32>
    %cst_80 = arith.constant dense<0.000000e+00> : vector<2x32xf32>
    %125 = tpu.matmul %122, %124, %cst_80 {dimension_numbers = #tpu.dot_dimension_numbers<[1], [0], [0], [1], [0, 0, 1, 1], [], []>} : vector<2x64xf32>, vector<64x32xf32>, vector<2x32xf32> -> vector<2x32xf32>
    %126 = arith.addf %102, %125 : vector<2x32xf32>
    %c5 = arith.constant 5 : index
    %c0_81 = arith.constant 0 : index
    %127 = memref.load %arg1[%c5, %c0_81] : memref<8x6xf32, #tpu.memory_space<smem>>
    %128 = vector.broadcast %127 : f32 to vector<2x64xf32>
    %129 = arith.mulf %128, %1 : vector<2x64xf32>
    %c5_82 = arith.constant 5 : index
    %c1_83 = arith.constant 1 : index
    %130 = memref.load %arg1[%c5_82, %c1_83] : memref<8x6xf32, #tpu.memory_space<smem>>
    %131 = vector.broadcast %130 : f32 to vector<2x64xf32>
    %132 = arith.mulf %131, %3 : vector<2x64xf32>
    %133 = arith.addf %129, %132 : vector<2x64xf32>
    %c5_84 = arith.constant 5 : index
    %c2_85 = arith.constant 2 : index
    %134 = memref.load %arg1[%c5_84, %c2_85] : memref<8x6xf32, #tpu.memory_space<smem>>
    %135 = vector.broadcast %134 : f32 to vector<2x64xf32>
    %136 = arith.mulf %135, %5 : vector<2x64xf32>
    %137 = arith.addf %133, %136 : vector<2x64xf32>
    %c5_86 = arith.constant 5 : index
    %c3_87 = arith.constant 3 : index
    %138 = memref.load %arg1[%c5_86, %c3_87] : memref<8x6xf32, #tpu.memory_space<smem>>
    %139 = vector.broadcast %138 : f32 to vector<2x64xf32>
    %140 = arith.mulf %139, %7 : vector<2x64xf32>
    %141 = arith.addf %137, %140 : vector<2x64xf32>
    %c5_88 = arith.constant 5 : index
    %c4_89 = arith.constant 4 : index
    %142 = memref.load %arg1[%c5_88, %c4_89] : memref<8x6xf32, #tpu.memory_space<smem>>
    %143 = vector.broadcast %142 : f32 to vector<2x64xf32>
    %144 = arith.addf %141, %143 : vector<2x64xf32>
    %cst_90 = arith.constant 0.000000e+00 : f32
    %145 = vector.broadcast %cst_90 : f32 to vector<2x64xf32>
    %146 = arith.maximumf %144, %145 : vector<2x64xf32>
    %c5_91 = arith.constant 5 : index
    %c0_92 = arith.constant 0 : index
    %c0_93 = arith.constant 0 : index
    %147 = vector.load %arg2[%c5_91, %c0_92, %c0_93] : memref<8x64x32xf32, #tpu.memory_space<vmem>>, vector<1x64x32xf32>
    %148 = vector.shape_cast %147 : vector<1x64x32xf32> to vector<64x32xf32>
    %cst_94 = arith.constant dense<0.000000e+00> : vector<2x32xf32>
    %149 = tpu.matmul %146, %148, %cst_94 {dimension_numbers = #tpu.dot_dimension_numbers<[1], [0], [0], [1], [0, 0, 1, 1], [], []>} : vector<2x64xf32>, vector<64x32xf32>, vector<2x32xf32> -> vector<2x32xf32>
    %150 = arith.addf %126, %149 : vector<2x32xf32>
    %c6 = arith.constant 6 : index
    %c0_95 = arith.constant 0 : index
    %151 = memref.load %arg1[%c6, %c0_95] : memref<8x6xf32, #tpu.memory_space<smem>>
    %152 = vector.broadcast %151 : f32 to vector<2x64xf32>
    %153 = arith.mulf %152, %1 : vector<2x64xf32>
    %c6_96 = arith.constant 6 : index
    %c1_97 = arith.constant 1 : index
    %154 = memref.load %arg1[%c6_96, %c1_97] : memref<8x6xf32, #tpu.memory_space<smem>>
    %155 = vector.broadcast %154 : f32 to vector<2x64xf32>
    %156 = arith.mulf %155, %3 : vector<2x64xf32>
    %157 = arith.addf %153, %156 : vector<2x64xf32>
    %c6_98 = arith.constant 6 : index
    %c2_99 = arith.constant 2 : index
    %158 = memref.load %arg1[%c6_98, %c2_99] : memref<8x6xf32, #tpu.memory_space<smem>>
    %159 = vector.broadcast %158 : f32 to vector<2x64xf32>
    %160 = arith.mulf %159, %5 : vector<2x64xf32>
    %161 = arith.addf %157, %160 : vector<2x64xf32>
    %c6_100 = arith.constant 6 : index
    %c3_101 = arith.constant 3 : index
    %162 = memref.load %arg1[%c6_100, %c3_101] : memref<8x6xf32, #tpu.memory_space<smem>>
    %163 = vector.broadcast %162 : f32 to vector<2x64xf32>
    %164 = arith.mulf %163, %7 : vector<2x64xf32>
    %165 = arith.addf %161, %164 : vector<2x64xf32>
    %c6_102 = arith.constant 6 : index
    %c4_103 = arith.constant 4 : index
    %166 = memref.load %arg1[%c6_102, %c4_103] : memref<8x6xf32, #tpu.memory_space<smem>>
    %167 = vector.broadcast %166 : f32 to vector<2x64xf32>
    %168 = arith.addf %165, %167 : vector<2x64xf32>
    %cst_104 = arith.constant 0.000000e+00 : f32
    %169 = vector.broadcast %cst_104 : f32 to vector<2x64xf32>
    %170 = arith.maximumf %168, %169 : vector<2x64xf32>
    %c6_105 = arith.constant 6 : index
    %c0_106 = arith.constant 0 : index
    %c0_107 = arith.constant 0 : index
    %171 = vector.load %arg2[%c6_105, %c0_106, %c0_107] : memref<8x64x32xf32, #tpu.memory_space<vmem>>, vector<1x64x32xf32>
    %172 = vector.shape_cast %171 : vector<1x64x32xf32> to vector<64x32xf32>
    %cst_108 = arith.constant dense<0.000000e+00> : vector<2x32xf32>
    %173 = tpu.matmul %170, %172, %cst_108 {dimension_numbers = #tpu.dot_dimension_numbers<[1], [0], [0], [1], [0, 0, 1, 1], [], []>} : vector<2x64xf32>, vector<64x32xf32>, vector<2x32xf32> -> vector<2x32xf32>
    %174 = arith.addf %150, %173 : vector<2x32xf32>
    %c7 = arith.constant 7 : index
    %c0_109 = arith.constant 0 : index
    %175 = memref.load %arg1[%c7, %c0_109] : memref<8x6xf32, #tpu.memory_space<smem>>
    %176 = vector.broadcast %175 : f32 to vector<2x64xf32>
    %177 = arith.mulf %176, %1 : vector<2x64xf32>
    %c7_110 = arith.constant 7 : index
    %c1_111 = arith.constant 1 : index
    %178 = memref.load %arg1[%c7_110, %c1_111] : memref<8x6xf32, #tpu.memory_space<smem>>
    %179 = vector.broadcast %178 : f32 to vector<2x64xf32>
    %180 = arith.mulf %179, %3 : vector<2x64xf32>
    %181 = arith.addf %177, %180 : vector<2x64xf32>
    %c7_112 = arith.constant 7 : index
    %c2_113 = arith.constant 2 : index
    %182 = memref.load %arg1[%c7_112, %c2_113] : memref<8x6xf32, #tpu.memory_space<smem>>
    %183 = vector.broadcast %182 : f32 to vector<2x64xf32>
    %184 = arith.mulf %183, %5 : vector<2x64xf32>
    %185 = arith.addf %181, %184 : vector<2x64xf32>
    %c7_114 = arith.constant 7 : index
    %c3_115 = arith.constant 3 : index
    %186 = memref.load %arg1[%c7_114, %c3_115] : memref<8x6xf32, #tpu.memory_space<smem>>
    %187 = vector.broadcast %186 : f32 to vector<2x64xf32>
    %188 = arith.mulf %187, %7 : vector<2x64xf32>
    %189 = arith.addf %185, %188 : vector<2x64xf32>
    %c7_116 = arith.constant 7 : index
    %c4_117 = arith.constant 4 : index
    %190 = memref.load %arg1[%c7_116, %c4_117] : memref<8x6xf32, #tpu.memory_space<smem>>
    %191 = vector.broadcast %190 : f32 to vector<2x64xf32>
    %192 = arith.addf %189, %191 : vector<2x64xf32>
    %cst_118 = arith.constant 0.000000e+00 : f32
    %193 = vector.broadcast %cst_118 : f32 to vector<2x64xf32>
    %194 = arith.maximumf %192, %193 : vector<2x64xf32>
    %c7_119 = arith.constant 7 : index
    %c0_120 = arith.constant 0 : index
    %c0_121 = arith.constant 0 : index
    %195 = vector.load %arg2[%c7_119, %c0_120, %c0_121] : memref<8x64x32xf32, #tpu.memory_space<vmem>>, vector<1x64x32xf32>
    %196 = vector.shape_cast %195 : vector<1x64x32xf32> to vector<64x32xf32>
    %cst_122 = arith.constant dense<0.000000e+00> : vector<2x32xf32>
    %197 = tpu.matmul %194, %196, %cst_122 {dimension_numbers = #tpu.dot_dimension_numbers<[1], [0], [0], [1], [0, 0, 1, 1], [], []>} : vector<2x64xf32>, vector<64x32xf32>, vector<2x32xf32> -> vector<2x32xf32>
    %198 = arith.addf %174, %197 : vector<2x32xf32>
    %c0_123 = arith.constant 0 : index
    %c0_124 = arith.constant 0 : index
    %199 = vector.load %arg3[%c0_123, %c0_124] : memref<2x32xf32, #tpu.memory_space<vmem>>, vector<2x32xf32>
    %200 = vector.extract_strided_slice %199 {offsets = [0, 0], sizes = [1, 32], strides = [1, 1]} : vector<2x32xf32> to vector<1x32xf32>
    %201 = vector.broadcast %200 : vector<1x32xf32> to vector<2x32xf32>
    %202 = arith.addf %198, %201 : vector<2x32xf32>
    %cst_125 = arith.constant 0.000000e+00 : f32
    %203 = vector.broadcast %cst_125 : f32 to vector<2x32xf32>
    %204 = arith.maximumf %202, %203 : vector<2x32xf32>
    %205 = vector.extract_strided_slice %199 {offsets = [1, 0], sizes = [1, 32], strides = [1, 1]} : vector<2x32xf32> to vector<1x32xf32>
    %206 = vector.broadcast %205 : vector<1x32xf32> to vector<2x32xf32>
    %207 = arith.mulf %204, %206 : vector<2x32xf32>
    %cst_126 = arith.constant dense<0.000000e+00> : vector<2xf32>
    %208 = vector.multi_reduction <add>, %207, %cst_126 [1] : vector<2x32xf32> to vector<2xf32>
    %209 = vector.shape_cast %208 : vector<2xf32> to vector<2x1xf32>
    %c0_127 = arith.constant 0 : index
    %c5_128 = arith.constant 5 : index
    %210 = memref.load %arg1[%c0_127, %c5_128] : memref<8x6xf32, #tpu.memory_space<smem>>
    %211 = vector.broadcast %210 : f32 to vector<2x1xf32>
    %212 = arith.addf %209, %211 : vector<2x1xf32>
    %cst_129 = arith.constant 0.000000e+00 : f32
    %213 = vector.broadcast %cst_129 : f32 to vector<2x1xf32>
    %214 = arith.subf %213, %212 : vector<2x1xf32>
    %215 = math.exp %214 : vector<2x1xf32>
    %cst_130 = arith.constant 1.000000e+00 : f32
    %216 = vector.broadcast %cst_130 : f32 to vector<2x1xf32>
    %217 = arith.addf %216, %215 : vector<2x1xf32>
    %cst_131 = arith.constant 1.000000e+00 : f32
    %218 = vector.broadcast %cst_131 : f32 to vector<2x1xf32>
    %219 = arith.divf %218, %217 : vector<2x1xf32>
    %c0_132 = arith.constant 0 : index
    %c0_133 = arith.constant 0 : index
    %220 = vector.load %arg4[%c0_132, %c0_133] : memref<2x1xf32, #tpu.memory_space<vmem>>, vector<2x1xf32>
    tpu.vector_store %arg4[%c0_132, %c0_133], %219 {strides = array<i32>} : memref<2x1xf32, #tpu.memory_space<vmem>>, vector<2x1xf32>,
    return
  }
}

</mosaic_0001>

<bundles_post_ra>
// kernel: output_block_forward.1
= control target key start
LH: loop header
LB: loop body
LE: loop exit
PB: predicated region body
PF: predicated region fallthrough
CT: control target
= control target key end

     0   :  { %9 = vsyncpa [#allocation3], 0  ;;  %s616_s18 = smov [#allocation2]   ;;  %s1002_s0 = inlined_call_operand.vmem [shape: f32[4,2,64], index: 0, kind: input, shape index: {}]   ;;  %s1003_s1 = inlined_call_operand.vmem [shape: f32[8,6], index: 1, kind: input, shape index: {}]   ;;  %s1004_s2 = inlined_call_operand.vmem [shape: f32[8,64,32], index: 2, kind: input, shape index: {}]   ;;  %s1005_s3 = inlined_call_operand.vmem [shape: f32[2,32], index: 3, kind: input, shape index: {}]   ;;  %s1006_s4 = inlined_call_operand.vmem [shape: f32[2,1], index: 4, kind: output, shape index: {}]  }
   0x1   :  { %s17_s17 = sshll.u32 %s1003_s1, 4  ;;  %s18_s17 = int_to_ptr.vmem [resolvable:$true] %s17_s17 }
   0x2   :  { %20 = dma.vmem_to_smem %s18_s17, 128, %s616_s18, [#allocation3]  }
   0x3   :  { %614 = dma.done.wait [#allocation3], 128  }
   0x4   :  { %615 = vsyncadd [#allocation3], 4294967168 }
   0x5   :  { %29 = sfence }
   0x6   :  { %v509_v0 = vld [vmem:[%s1004_s2 + $0x78] sm:$0xff]  ;;  %v508_v2 = vld [vmem:[%s1004_s2 + $0x70] sm:$0xff]  ;;  %s654_s25 = sld [smem:[#allocation2 + $0x100]]  ;;  %v507_v6 = vld [vmem:[%s1004_s2 + $0x68] sm:$0xff]  ;;  %vm92_vm0 = vcmask 523264   ;;  %vm457_vm1 = vcmask 254976  }
   0x7   :  { %v524_v1 = vld [vmem:[%s1004_s2 + $0xb8] sm:$0xff]  ;;  %104 = vmatpush.msra.mxu0 %v509_v0  ;;  %v523_v4 = vld [vmem:[%s1004_s2 + $0xb0] sm:$0xff]  ;;  %s665_s5 = sld [smem:[#allocation2 + $0x101]]  ;;  %v522_v8 = vld [vmem:[%s1004_s2 + $0xa8] sm:$0xff]  ;;  %vm483_vm5 = vcmask 1024  }
   0x8   :  { %178 = vmatpush.msra.mxu2 %v524_v1  ;;  %v63_v3 = vld [vmem:[%s1004_s2 + $0x38] sm:$0xff]  ;;  %v62_v7 = vld [vmem:[%s1004_s2 + $0x30] sm:$0xff]  ;;  %s676_s12 = sld [smem:[#allocation2 + $0x102]]  ;;  %v61_v10 = vld [vmem:[%s1004_s2 + $0x28] sm:$0xff] }
   0x9   :  { %v538_v5 = vld [vmem:[%s1004_s2 + $0xf8] sm:$0xff]  ;;  %127 = vmatpush.msra.mxu1 %v63_v3  ;;  %105 = vmatpush.msra.mxu0 %v508_v2  ;;  %v537_v9 = vld [vmem:[%s1004_s2 + $0xf0] sm:$0xff]  ;;  %s684_s17 = sld [smem:[#allocation2 + $0x103]]  ;;  %v506_v11 = vld [vmem:[%s1004_s2 + $0x60] sm:$0xff] }
   0xa   :  { %230 = vmatpush.msra.mxu3 %v538_v5  ;;  %179 = vmatpush.msra.mxu2 %v523_v4  ;;  %v521_v12 = vld [vmem:[%s1004_s2 + $0xa0] sm:$0xff]  ;;  %v536_v13 = vld [vmem:[%s1004_s2 + $0xe8] sm:$0xff]  ;;  %s695_s24 = sld [smem:[#allocation2 + $0x104]]  ;;  %v505_v16 = vld [vmem:[%s1004_s2 + $0x58] sm:$0xff] }
   0xb   :  { %128 = vmatpush.msra.mxu1 %v62_v7  ;;  %106 = vmatpush.msra.mxu0 %v507_v6  ;;  %v60_v14 = vld [vmem:[%s1004_s2 + $0x20] sm:$0xff]  ;;  %s703_s29 = sld [smem:[#allocation2 + $0x80]]  ;;  %v520_v17 = vld [vmem:[%s1004_s2 + $0x98] sm:$0xff]  ;;  %v504_v20 = vld [vmem:[%s1004_s2 + $0x50] sm:$0xff] }
   0xc   :  { %231 = vmatpush.msra.mxu3 %v537_v9  ;;  %180 = vmatpush.msra.mxu2 %v522_v8  ;;  %v535_v15 = vld [vmem:[%s1004_s2 + $0xe0] sm:$0xff]  ;;  %s711_s9 = sld [smem:[#allocation2 + $0x81]]  ;;  %v59_v18 = vld [vmem:[%s1004_s2 + $0x18] sm:$0xff]  ;;  %v519_v21 = vld [vmem:[%s1004_s2 + $0x90] sm:$0xff]  ;;  %v140_v24 = vstv %s654_s25 }
   0xd   :  { %129 = vmatpush.msra.mxu1 %v61_v10  ;;  %107 = vmatpush.msra.mxu0 %v506_v11  ;;  %v534_v19 = vld [vmem:[%s1004_s2 + $0xd8] sm:$0xff]  ;;  %s719_s15 = sld [smem:[#allocation2 + $0x82]]  ;;  %v58_v22 = vld [vmem:[%s1004_s2 + $0x10] sm:$0xff]  ;;  %v503_v25 = vld [vmem:[%s1004_s2 + $0x48] sm:$0xff]  ;;  %v143_v28 = vstv %s665_s5 }
   0xe   :  { %232 = vmatpush.msra.mxu3 %v536_v13  ;;  %181 = vmatpush.msra.mxu2 %v521_v12  ;;  %s727_s21 = sld [smem:[#allocation2 + $0x83]]  ;;  %v533_v23 = vld [vmem:[%s1004_s2 + $0xd0] sm:$0xff]  ;;  %v518_v26 = vld [vmem:[%s1004_s2 + $0x88] sm:$0xff]  ;;  %v502_v27 = vld [vmem:[%s1004_s2 + $0x40] sm:$0xff]  ;;  %v147_v32 = vstv %s676_s12 }
   0xf   :  { %130 = vmatpush.msra.mxu1 %v60_v14  ;;  %108 = vmatpush.msra.mxu0 %v505_v16  ;;  %s736_s27 = sld [smem:[#allocation2 + $0x84]]  ;;  %v57_v29 = vld [vmem:[%s1004_s2 + $0x8] sm:$0xff]  ;;  %v517_v30 = vld [vmem:[%s1004_s2 + $0x80] sm:$0xff]  ;;  %v552_v33 = vld [vmem:[%s1004_s2 + $0x138] sm:$0xff]  ;;  %v151_v36 = vstv %s684_s17 }
  0x10   :  { %233 = vmatpush.msra.mxu3 %v535_v15  ;;  %182 = vmatpush.msra.mxu2 %v520_v17  ;;  %s748_s11 = sld [smem:[#allocation2 + $0x180]]  ;;  %v532_v31 = vld [vmem:[%s1004_s2 + $0xc8] sm:$0xff]  ;;  %v580_v34 = vld [vmem:[%s1004_s2 + $0x1b8] sm:$0xff]  ;;  %v56_v35 = vld [vmem:[%s1004_s2] sm:$0xff]  ;;  %v155_v10 = vstv %s695_s24 }
  0x11   :  { %131 = vmatpush.msra.mxu1 %v59_v18  ;;  %109 = vmatpush.msra.mxu0 %v504_v20  ;;  %s760_s5 = sld [smem:[#allocation2 + $0x181]]  ;;  %v531_v37 = vld [vmem:[%s1004_s2 + $0xc0] sm:$0xff]  ;;  %v65_v38 = vstv %s703_s29  ;;  %v551_v45 = vld [vmem:[%s1004_s2 + $0x130] sm:$0xff]  ;;  %v566_v46 = vld [vmem:[%s1004_s2 + $0x178] sm:$0xff] }
  0x12   :  { %234 = vmatpush.msra.mxu3 %v534_v19  ;;  %183 = vmatpush.msra.mxu2 %v519_v21  ;;  %s772_s30 = sld [smem:[#allocation2 + $0x182]]  ;;  %v68_v39 = vstv %s711_s9  ;;  %v785_v41 = vld [vmem:[%s1002_s0] sm:$0x3]  ;;  %v790_v42 = vld [vmem:[%s1002_s0 + $0x2] sm:$0x3]  ;;  %v579_v51 = vld [vmem:[%s1004_s2 + $0x1b0] sm:$0xff] }
  0x13   :  { %132 = vmatpush.msra.mxu1 %v58_v22  ;;  %110 = vmatpush.msra.mxu0 %v503_v25  ;;  %v72_v40 = vstv %s719_s15  ;;  %s780_s7 = sld [smem:[#allocation2 + $0x183]]  ;;  %v795_v43 = vld [vmem:[%s1002_s0 + $0x4] sm:$0x3]  ;;  %v807_v47 = vld [vmem:[%s1002_s0 + $0x6] sm:$0x3]  ;;  %v141_v48 = vmul.f32 %v140_v24, %v785_v41  ;;  %v144_v49 = vmul.f32 %v790_v42, %v143_v28  ;;  %v594_v52 = vld [vmem:[%s1004_s2 + $0x1f8] sm:$0xff]  ;;  %v66_v54 = vmul.f32 %v65_v38, %v785_v41 }
  0x14   :  { %235 = vmatpush.msra.mxu3 %v533_v23  ;;  %184 = vmatpush.msra.mxu2 %v518_v26  ;;  %v76_v44 = vstv %s727_s21  ;;  %v148_v50 = vmul.f32 %v795_v43, %v147_v32  ;;  %s812_s21 = sld [smem:[#allocation2 + $0x184]]  ;;  %v152_v53 = vmul.f32 %v807_v47, %v151_v36  ;;  %v69_v55 = vmul.f32 %v790_v42, %v68_v39  ;;  %v550_v57 = vld [vmem:[%s1004_s2 + $0x128] sm:$0xff]  ;;  %v565_v58 = vld [vmem:[%s1004_s2 + $0x170] sm:$0xff]  ;;  %v549_v6 = vld [vmem:[%s1004_s2 + $0x120] sm:$0xff] }
  0x15   :  { %133 = vmatpush.msra.mxu1 %v57_v29  ;;  %111 = vmatpush.msra.mxu0 %v502_v27  ;;  %s824_s0 = sld [smem:[#allocation2]]  ;;  %v145_v59 = vadd.f32 %v144_v49, %v141_v48  ;;  %v73_v60 = vmul.f32 %v795_v43, %v72_v40  ;;  %v77_v61 = vmul.f32 %v807_v47, %v76_v44  ;;  %v578_v63 = vld [vmem:[%s1004_s2 + $0x1a8] sm:$0xff]  ;;  %v593_v0 = vld [vmem:[%s1004_s2 + $0x1f0] sm:$0xff]  ;;  %v577_v11 = vld [vmem:[%s1004_s2 + $0x1a0] sm:$0xff]  ;;  %v80_v17 = vstv %s736_s27 }
  0x16   :  { %236 = vmatpush.msra.mxu3 %v532_v31  ;;  %185 = vmatpush.msra.mxu2 %v517_v30  ;;  %v192_v56 = vstv %s748_s11  ;;  %s835_s11 = sld [smem:[#allocation2 + $0x1]]  ;;  %v70_v1 = vadd.f32 %v69_v55, %v66_v54  ;;  %v564_v7 = vld [vmem:[%s1004_s2 + $0x168] sm:$0xff]  ;;  %v548_v18 = vld [vmem:[%s1004_s2 + $0x118] sm:$0xff]  ;;  %v563_v19 = vld [vmem:[%s1004_s2 + $0x160] sm:$0xff] }
  0x17   :  { %282 = vmatpush.msrb.mxu0 %v552_v33  ;;  %134 = vmatpush.msra.mxu1 %v56_v35  ;;  %v195_v62 = vstv %s760_s5  ;;  %v193_v2 = vmul.f32 %v192_v56, %v785_v41  ;;  %s846_s5 = sld [smem:[#allocation2 + $0x2]]  ;;  %v149_v5 = vadd.f32 %v148_v50, %v145_v59  ;;  %v592_v12 = vld [vmem:[%s1004_s2 + $0x1e8] sm:$0xff]  ;;  %v576_v22 = vld [vmem:[%s1004_s2 + $0x198] sm:$0xff]  ;;  %v591_v23 = vld [vmem:[%s1004_s2 + $0x1e0] sm:$0xff] }
  0x18   :  { %386 = vmatpush.msrb.mxu2 %v580_v34  ;;  %237 = vmatpush.msra.mxu3 %v531_v37  ;;  %v196_v3 = vmul.f32 %v790_v42, %v195_v62  ;;  %v199_v4 = vstv %s772_s30  ;;  %s856_s15 = sld [smem:[#allocation2 + $0x3]]  ;;  %v74_v13 = vadd.f32 %v73_v60, %v70_v1  ;;  %v547_v29 = vld [vmem:[%s1004_s2 + $0x110] sm:$0xff]  ;;  %v562_v30 = vld [vmem:[%s1004_s2 + $0x158] sm:$0xff]  ;;  %v546_v48 = vld [vmem:[%s1004_s2 + $0x108] sm:$0xff] }
  0x19   :  { %283 = vmatpush.msrb.mxu0 %v551_v45  ;;  %334 = vmatpush.msrb.mxu1 %v566_v46  ;;  %v200_v8 = vmul.f32 %v795_v43, %v199_v4  ;;  %v203_v9 = vstv %s780_s7  ;;  %s866_s20 = sld [smem:[#allocation2 + $0x4]]  ;;  %v153_v16 = vadd.f32 %v152_v53, %v149_v5  ;;  %v590_v35 = vld [vmem:[%s1004_s2 + $0x1d8] sm:$0xff]  ;;  %v575_v39 = vld [vmem:[%s1004_s2 + $0x190] sm:$0xff]  ;;  %v574_v50 = vld [vmem:[%s1004_s2 + $0x188] sm:$0xff] }
  0x1a   :  { %387 = vmatpush.msrb.mxu2 %v579_v51  ;;  %438 = vmatpush.msrb.mxu3 %v594_v52  ;;  %v197_v14 = vadd.f32 %v196_v3, %v193_v2  ;;  %v204_v15 = vmul.f32 %v807_v47, %v203_v9  ;;  %s875_s1 = sld [smem:[#allocation2 + $0x200]]  ;;  %v78_v20 = vadd.f32 %v77_v61, %v74_v13  ;;  %v207_v26 = vstv %s812_s21  ;;  %v561_v49 = vld [vmem:[%s1004_s2 + $0x150] sm:$0xff]  ;;  %v545_v55 = vld [vmem:[%s1004_s2 + $0x100] sm:$0xff]  ;;  %v560_v59 = vld [vmem:[%s1004_s2 + $0x148] sm:$0xff] }
  0x1b   :  { %284 = vmatpush.msrb.mxu0 %v550_v57  ;;  %335 = vmatpush.msrb.mxu1 %v565_v58  ;;  %v38_v24 = vstv %s824_s0  ;;  %s884_s6 = sld [smem:[#allocation2 + $0x201]]  ;;  %v156_v25 = vadd.f32 %v155_v10, %v153_v16  ;;  %v589_v54 = vld [vmem:[%s1004_s2 + $0x1d0] sm:$0xff]  ;;  %v573_v60 = vld [vmem:[%s1004_s2 + $0x180] sm:$0xff] }
  0x1c   :  { %388 = vmatpush.msrb.mxu2 %v578_v63  ;;  %439 = vmatpush.msrb.mxu3 %v593_v0  ;;  %v201_v21 = vadd.f32 %v200_v8, %v197_v14  ;;  %v39_v27 = vmul.f32 %v38_v24, %v785_v41  ;;  %v41_v28 = vstv %s835_s11  ;;  %s895_s0 = sld [smem:[#allocation2 + $0x202]]  ;;  %v81_v31 = vadd.f32 %v80_v17, %v78_v20  ;;  %v588_v0 = vld [vmem:[%s1004_s2 + $0x1c8] sm:$0xff]  ;;  %v559_v5 = vld [vmem:[%s1004_s2 + $0x140] sm:$0xff] }
  0x1d   :  { %285 = vmatpush.msrb.mxu0 %v549_v6  ;;  %336 = vmatpush.msrb.mxu1 %v564_v7  ;;  %v42_v33 = vmul.f32 %v790_v42, %v41_v28  ;;  %v45_v34 = vstv %s846_s5  ;;  %s902_s13 = sld [smem:[#allocation2 + $0x203]]  ;;  %v157_v36 = vmax.f32 %v156_v25, 0.0  ;;  %v587_v8 = vld [vmem:[%s1004_s2 + $0x1c0] sm:$0xff] }
  0x1e   :  { %389 = vmatpush.msrb.mxu2 %v577_v11  ;;  %440 = vmatpush.msrb.mxu3 %v592_v12  ;;  %v205_v32 = vadd.f32 %v204_v15, %v201_v21  ;;  %v46_v37 = vmul.f32 %v795_v43, %v45_v34  ;;  %v49_v38 = vstv %s856_s15  ;;  %s909_s9 = sld [smem:[#allocation2 + $0x204]]  ;;  %v82_v40 = vmax.f32 %v81_v31, 0.0 }
  0x1f   :  { %286 = vmatpush.msrb.mxu0 %v548_v18  ;;  %337 = vmatpush.msrb.mxu1 %v563_v19  ;;  %v43_v45 = vadd.f32 %v42_v33, %v39_v27  ;;  %v50_v46 = vmul.f32 %v807_v47, %v49_v38  ;;  %s918_s18 = sld [smem:[#allocation2 + $0x300]]  ;;  %v53_v58 = vstv %s866_s20 }
  0x20   :  { %390 = vmatpush.msrb.mxu2 %v576_v22  ;;  %441 = vmatpush.msrb.mxu3 %v591_v23  ;;  %v208_v44 = vadd.f32 %v207_v26, %v205_v32  ;;  %v244_v51 = vstv %s875_s1  ;;  %s925_s7 = sld [smem:[#allocation2 + $0x301]] }
  0x21   :  { %287 = vmatpush.msrb.mxu0 %v547_v29  ;;  %338 = vmatpush.msrb.mxu1 %v562_v30  ;;  %v47_v53 = vadd.f32 %v46_v37, %v43_v45  ;;  %v245_v56 = vmul.f32 %v244_v51, %v785_v41  ;;  %v247_v57 = vstv %s884_s6  ;;  %s936_s1 = sld [smem:[#allocation2 + $0x302]] }
  0x22   :  { %525 = vmatmul.msk.f32.vlgmr.msra.gmra.mxu2 %vm92_vm0, %v157_v36  ;;  %442 = vmatpush.msrb.mxu3 %v590_v35  ;;  %v209_v52 = vmax.f32 %v208_v44, 0.0  ;;  %v248_v61 = vmul.f32 %v790_v42, %v247_v57  ;;  %v251_v62 = vstv %s895_s0  ;;  %s947_s17 = sld [smem:[#allocation2 + $0x303]] }
  0x23   :  { %510 = vmatmul.msk.f32.vlgmr.msra.gmra.mxu0 %vm92_vm0, %v82_v40  ;;  %391 = vmatpush.msrb.mxu2 %v575_v39  ;;  %v51_v63 = vadd.f32 %v50_v46, %v47_v53  ;;  %v252_v1 = vmul.f32 %v795_v43, %v251_v62  ;;  %v255_v2 = vstv %s902_s13  ;;  %s955_s25 = sld [smem:[#allocation2 + $0x304]] }
  0x24   :  { %288 = vmatpush.msrb.mxu0 %v546_v48  ;;  %339 = vmatpush.msrb.mxu1 %v561_v49  ;;  %v249_v3 = vadd.f32 %v248_v61, %v245_v56  ;;  %v256_v4 = vmul.f32 %v807_v47, %v255_v2  ;;  %s961_s11 = sld [smem:[#allocation2 + $0x280]]  ;;  %v259_v13 = vstv %s909_s9 }
  0x25   :  { %539 = vmatmul.msk.f32.vlgmr.msra.gmra.mxu3 %vm92_vm0, %v209_v52  ;;  %392 = vmatpush.msrb.mxu2 %v574_v50  ;;  %v54_v6 = vadd.f32 %v53_v58, %v51_v63  ;;  %v348_v7 = vstv %s918_s18  ;;  %s967_s29 = sld [smem:[#allocation2 + $0x281]] }
  0x26   :  { %443 = vmatpush.msrb.mxu3 %v589_v54  ;;  %289 = vmatpush.msrb.mxu0 %v545_v55  ;;  %v253_v9 = vadd.f32 %v252_v1, %v249_v3  ;;  %v349_v10 = vmul.f32 %v348_v7, %v785_v41  ;;  %v351_v11 = vstv %s925_s7  ;;  %s556_s5 = sld [smem:[#allocation2 + $0x282]] }
  0x27   :  { %340 = vmatpush.msrb.mxu1 %v560_v59  ;;  %393 = vmatpush.msrb.mxu2 %v573_v60  ;;  %v55_v12 = vmax.f32 %v54_v6, 0.0  ;;  %v352_v14 = vmul.f32 %v790_v42, %v351_v11  ;;  %v355_v15 = vstv %s936_s1  ;;  %s557_s30 = sld [smem:[#allocation2 + $0x283]] }
  0x28   :  { %444 = vmatpush.msrb.mxu3 %v588_v0  ;;  %v257_v16 = vadd.f32 %v256_v4, %v253_v9  ;;  %v356_v17 = vmul.f32 %v795_v43, %v355_v15  ;;  %v359_v18 = vstv %s947_s17  ;;  %s976_s2 = sld [smem:[#allocation2 + $0x284]]  ;;  %v451_v4 = vld [vmem:[%s1005_s3] sm:$0x3] }
  0x29   :  { %341 = vmatpush.msrb.mxu1 %v559_v5  ;;  %v353_v19 = vadd.f32 %v352_v14, %v349_v10  ;;  %v360_v20 = vmul.f32 %v807_v47, %v359_v18  ;;  %s582_s9 = sld [smem:[#allocation2 + $0x380]]  ;;  %v363_v27 = vstv %s955_s25  ;;  %v452_v6 = vperm.slane %v451_v4, 0 }
  0x2a   :  { %445 = vmatpush.msrb.mxu3 %v587_v8  ;;  %511 = vmatmul.msk.f32.vlgmr.msra.gmra.mxu1 %vm92_vm0, %v55_v12  ;;  %v260_v21 = vadd.f32 %v259_v13, %v257_v16  ;;  %v296_v22 = vstv %s961_s11  ;;  %s583_s16 = sld [smem:[#allocation2 + $0x381]]  ;;  %v455_v10 = vperm.slane %v451_v4, 1 }
  0x2b   :  { %v357_v23 = vadd.f32 %v356_v17, %v353_v19  ;;  %v297_v24 = vmul.f32 %v296_v22, %v785_v41  ;;  %v299_v25 = vstv %s967_s29  ;;  %s584_s15 = sld [smem:[#allocation2 + $0x382]] }
  0x2c   :  { %v261_v26 = vmax.f32 %v260_v21, 0.0  ;;  %v300_v28 = vmul.f32 %v790_v42, %v299_v25  ;;  %v303_v29 = vstv %s556_s5  ;;  %s585_s18 = sld [smem:[#allocation2 + $0x383]] }
  0x2d   :  { %v361_v30 = vadd.f32 %v360_v20, %v357_v23  ;;  %v304_v31 = vmul.f32 %v795_v43, %v303_v29  ;;  %v307_v32 = vstv %s557_s30  ;;  %s586_s19 = sld [smem:[#allocation2 + $0x384]] }
  0x2e   :  { %553 = vmatmul.msk.f32.vlgmr.msrb.gmra.mxu0 %vm92_vm0, %v261_v26  ;;  %v301_v33 = vadd.f32 %v300_v28, %v297_v24  ;;  %v308_v34 = vmul.f32 %v807_v47, %v307_v32  ;;  %v311_v44 = vstv %s976_s2  ;;  %s596_s22 = sld [smem:[#allocation2 + $0x5]] }
  0x2f   :  { %v364_v35 = vadd.f32 %v363_v27, %v361_v30  ;;  %v400_v36 = vstv %s582_s9 }
  0x30   :  { %v305_v37 = vadd.f32 %v304_v31, %v301_v33  ;;  %v401_v38 = vmul.f32 %v400_v36, %v785_v41  ;;  %v403_v39 = vstv %s583_s16 }
  0x31   :  { %v365_v40 = vmax.f32 %v364_v35, 0.0  ;;  %v404_v45 = vmul.f32 %v790_v42, %v403_v39  ;;  %v407_v46 = vstv %s584_s15 }
  0x32   :  { %v309_v48 = vadd.f32 %v308_v34, %v305_v37  ;;  %v408_v49 = vmul.f32 %v795_v43, %v407_v46  ;;  %v411_v50 = vstv %s585_s18 }
  0x33   :  { %581 = vmatmul.msk.f32.vlgmr.msrb.gmra.mxu2 %vm92_vm0, %v365_v40  ;;  %v405_v51 = vadd.f32 %v404_v45, %v401_v38  ;;  %v412_v52 = vmul.f32 %v807_v47, %v411_v50  ;;  %v415_v56 = vstv %s586_s19 }
  0x34   :  { %v312_v53 = vadd.f32 %v311_v44, %v309_v48  ;;  %v462_v14 = vstv %s596_s22 }
  0x35   :  { %v409_v54 = vadd.f32 %v408_v49, %v405_v51 }
  0x36   :  { %v313_v55 = vmax.f32 %v312_v53, 0.0 }
  0x37   :  { %v413_v41 = vadd.f32 %v412_v52, %v409_v54 }
  0x38   :  { %567 = vmatmul.msk.f32.vlgmr.msrb.gmra.mxu1 %vm92_vm0, %v313_v55 }
  0x39   :  { %v416_v57 = vadd.f32 %v415_v56, %v413_v41 }
  0x3b   :  { %v417_v58 = vmax.f32 %v416_v57, 0.0 }
  0x3d   :  { %595 = vmatmul.msk.f32.vlgmr.msrb.gmra.mxu3 %vm92_vm0, %v417_v58 }
  0xa0   :  { %v113_v59 = vpop.f32.mrf.mxu0 }
  0xa5   :  { %v187_v60 = vpop.f32.mrf.mxu2 }
  0xa7   :  { %v136_v42 = vpop.f32.mrf.mxu1 }
  0xa8   :  { %v137_v43 = vadd.f32 %v136_v42, %v113_v59  ;;  %v239_v62 = vpop.f32.mrf.mxu3 }
  0xaa   :  { %v190_v61 = vadd.f32 %v187_v60, %v137_v43 }
  0xab   :  { %v291_v0 = vpop.f32.mrf.mxu0 }
  0xac   :  { %v242_v63 = vadd.f32 %v239_v62, %v190_v61 }
  0xae   :  { %v294_v47 = vadd.f32 %v291_v0, %v242_v63 }
  0xb5   :  { %v343_v1 = vpop.f32.mrf.mxu1 }
  0xb6   :  { %v395_v2 = vpop.f32.mrf.mxu2  ;;  %v346_v3 = vadd.f32 %v343_v1, %v294_v47 }
  0xb8   :  { %v398_v5 = vadd.f32 %v395_v2, %v346_v3 }
  0xc0   :  { %v447_v7 = vpop.f32.mrf.mxu3 }
  0xc1   :  { %v450_v8 = vadd.f32 %v447_v7, %v398_v5 }
  0xc3   :  { %v453_v9 = vadd.f32 %v452_v6, %v450_v8 }
  0xc5   :  { %v454_v11 = vmax.f32 %v453_v9, 0.0 }
  0xc7   :  { %v456_v12 = vmul.f32 %v455_v10, %v454_v11 }
  0xc9   :  { %v458_v13 = vsel %vm457_vm1, %v456_v12, 0.0 }
  0xca   :  { %459 = vadd.xlane.f32.xlu0 %v458_v13 }
 0x13d   :  { %v460_v15 = vpop.xlane.xlu0 %459 }
 0x13e   :  { %v463_v16 = vadd.f32 %v462_v14, %v460_v15 }
 0x140   :  { %v464_v17 = vsub.f32 0.0, %v463_v16 }
 0x142   :  { %v465_v18 = vmul.f32 1.442695, %v464_v17 }
 0x144   :  { %598 = vpow2.f32 %v465_v18 }
 0x14a   :  { %v599_v19 = vpop.eup %598 }
 0x14b   :  { %v467_v20 = vadd.f32 1.0, %v599_v19 }
 0x14d   :  { %600 = vrcp.f32 %v467_v20  ;;  %v479_v24 = vand.u32 2147483648, %v467_v20  ;;  %v477_v26 = vand.u32 2147483647, %v467_v20  ;;  %vm473_vm3 = vweird.f32 %v467_v20 }
 0x14f   :  { %v480_v28 = vor.u32 1.1754944e-38, %v479_v24  ;;  %vm478_vm6 = vcmp.eq.f32.partialorder %v477_v26, 8.507059e+37 }
 0x153   :  { %v601_v21 = vpop.eup %600 }
 0x154   :  { %v469_v22 = vmul.f32 %v601_v21, %v467_v20  ;;  %vm474_vm2 = vweird.f32 %v601_v21 }
 0x155   :  { %vm475_vm4 = vmor %vm473_vm3, %vm474_vm2 }
 0x156   :  { %v470_v23 = vsub.f32 1.0, %v469_v22 }
 0x158   :  { %v471_v25 = vmul.f32 %v601_v21, %v470_v23 }
 0x15a   :  { %v472_v27 = vadd.f32 %v601_v21, %v471_v25 }
 0x15c   :  { %v476_v29 = vsel %vm475_vm4, %v601_v21, %v472_v27 }
 0x15d   :  { %v481_v30 = vsel %vm478_vm6, %v480_v28, %v476_v29 }
 0x15e   :  { %484 = vst.msk [vmem:[%s1006_s4] sm:$0x3] %vm483_vm5, %v481_v30 }
 0x15f   :  { %489 = vsyncpa [#allocation3], 1 }

</bundles_post_ra>
